<compile_context>
chip_gen: v7x
topology: tpu7x:2x2x1
jax: 0.10.0
libtpu: 0.0.40
codegen_flags: <defaults>
</compile_context>

<pallas_src>
import jax
import jax.numpy as jnp
import numpy as np
from jax.experimental import pallas as pl
from jax.experimental.pallas import tpu as pltpu


def _lambda_shortcut_kernel(x_ref, sel_ref, o_ref):
    # x_ref  : (NT, C, H*W)
    # sel_ref: (H*W, H_out*W_out)        0/1 column-selection matrix
    # o_ref  : (NT, C_out, H_out*W_out)  with C_out = C + 2*pad_c
    nt, c, hw = x_ref.shape
    c_out, hwo = o_ref.shape[1], o_ref.shape[2]
    pad_c = (c_out - c) // 2

    # Fused stride-2 selection over H and W: one lane-dense MXU matmul.
    xr = x_ref[...].reshape(nt * c, hw)
    ds = jnp.dot(xr, sel_ref[...], preferred_element_type=jnp.float32)
    ds = ds.reshape(nt, c, hwo).astype(o_ref.dtype)

    # Zero only the channel pad bands, then slice-store the data band.
    if pad_c > 0:
        band = jnp.zeros((nt, pad_c, hwo), o_ref.dtype)
        o_ref[:, :pad_c, :] = band
        o_ref[:, pad_c + c:, :] = band
    o_ref[:, pad_c:pad_c + c, :] = ds


def _pick_n_tile(n, per_image_bytes, budget_bytes=8 << 20, max_tile=64):
    """Largest divisor of n (<= max_tile) whose block fits the VMEM budget."""
    cap = max(1, min(n, max_tile, budget_bytes // max(per_image_bytes, 1)))
    for t in range(cap, 0, -1):
        if n % t == 0:
            return t
    return 1


def lambda_layer(x, planes):
    """Pallas version of the option-A shortcut LambdaLayer (NCHW in / NCHW out)."""
    n, c, h, w = x.shape
    pad_c = planes // 4
    assert pad_c >= 0, "negative channel padding is not supported"
    h_out = (h + 1) // 2
    w_out = (w + 1) // 2
    c_out = c + 2 * pad_c
    hw = h * w
    hwo = h_out * w_out

    # Lane-dense presentation: flatten spatial dims (contiguous, free reshape).
    x_flat = x.reshape(n, c, hw)

    # Fused selection matrix: sel[2*r*W + 2*q, r*W_out + q] = 1
    rows = jnp.arange(hw)
    cols = jnp.arange(hwo)
    rh = rows[:, None] // w
    rw = rows[:, None] % w
    oh = cols[None, :] // w_out
    ow = cols[None, :] % w_out
    sel = ((rh == 2 * oh) & (rw == 2 * ow)).astype(x.dtype)

    itemsize = jnp.dtype(x.dtype).itemsize
    per_image = (c * hw + c_out * hwo) * itemsize
    n_tile = _pick_n_tile(n, per_image)

    blk_bytes = (n_tile * c * hw + hw * hwo + n_tile * c_out * hwo) * itemsize
    # Double-buffered in/out blocks + headroom; cap keeps v7x (64 MiB VMEM) safe.
    vmem_limit = int(min(max(4 * blk_bytes, 16 << 20), 48 << 20))

    out_flat = pl.pallas_call(
        _lambda_shortcut_kernel,
        out_shape=jax.ShapeDtypeStruct((n, c_out, hwo), x.dtype),
        grid_spec=pltpu.PrefetchScalarGridSpec(
            num_scalar_prefetch=0,
            grid=(n // n_tile,),
            in_specs=[
                pl.BlockSpec((n_tile, c, hw), lambda i: (i, 0, 0)),
                # constant index_map -> selection matrix stays resident in VMEM
                pl.BlockSpec((hw, hwo), lambda i: (0, 0)),
            ],
            out_specs=pl.BlockSpec((n_tile, c_out, hwo), lambda i: (i, 0, 0)),
        ),
        compiler_params=pltpu.CompilerParams(
            dimension_semantics=("parallel",),
            vmem_limit_bytes=vmem_limit),
    )(x_flat, sel)

    return out_flat.reshape(n, c_out, h_out, w_out)


if __name__ == "__main__":
    key = jax.random.PRNGKey(0)
    n, c, h, w = 2, 4, 16, 16
    planes = 2 * c          # option-A shortcut doubles channels; pad = planes//4 per side
    x = jax.random.normal(key, (n, c, h, w), dtype=jnp.float32)

    out = jax.block_until_ready(lambda_layer(x, planes))

    # pure-JAX reference of the wrapped lambda
    ref = jnp.pad(x[:, :, ::2, ::2],
                  ((0, 0), (planes // 4, planes // 4), (0, 0), (0, 0)))
    assert out.shape == ref.shape, (out.shape, ref.shape)
    assert np.allclose(np.asarray(out), np.asarray(ref)), "numerical mismatch"
    print("KERNEL_OK")
</pallas_src>

<mosaic_0001>
module attributes {stable_mosaic.version = 11 : i64} {
  func.func @_lambda_shortcut_kernel(%arg0: i32, %arg1: memref<2x4x256xf32, #tpu.memory_space<vmem>>, %arg2: memref<256x64xf32, #tpu.memory_space<vmem>>, %arg3: memref<2x8x64xf32, #tpu.memory_space<vmem>>) attributes {dimension_semantics = [#tpu.dimension_semantics<parallel>], iteration_bounds = array<i64: 1>, scalar_prefetch = 0 : i64, scratch_operands = 0 : i64, tpu.core_type = #tpu.core_type<tc>, window_params = [{transform_indices = @transform_0, window_bounds = array<i64: 2, 4, 256>}, {pipeline_mode = #tpu.pipeline_mode<synchronous>, transform_indices = @transform_1, window_bounds = array<i64: 256, 64>}, {transform_indices = @transform_2, window_bounds = array<i64: 2, 8, 64>}]} {
    %c0 = arith.constant 0 : index
    %c0_0 = arith.constant 0 : index
    %c0_1 = arith.constant 0 : index
    %0 = vector.load %arg1[%c0, %c0_0, %c0_1] : memref<2x4x256xf32, #tpu.memory_space<vmem>>, vector<2x4x256xf32>
    %1 = vector.shape_cast %0 : vector<2x4x256xf32> to vector<8x256xf32>
    %c0_2 = arith.constant 0 : index
    %c0_3 = arith.constant 0 : index
    %2 = vector.load %arg2[%c0_2, %c0_3] : memref<256x64xf32, #tpu.memory_space<vmem>>, vector<256x64xf32>
    %cst = arith.constant dense<0.000000e+00> : vector<8x64xf32>
    %3 = tpu.matmul %1, %2, %cst {dimension_numbers = #tpu.dot_dimension_numbers<[1], [0], [0], [1], [0, 0, 1, 1], [], []>} : vector<8x256xf32>, vector<256x64xf32>, vector<8x64xf32> -> vector<8x64xf32>
    %4 = vector.shape_cast %3 : vector<8x64xf32> to vector<2x4x64xf32>
    %cst_4 = arith.constant 0.000000e+00 : f32
    %5 = vector.broadcast %cst_4 : f32 to vector<2x2x64xf32>
    %c0_5 = arith.constant 0 : index
    %c0_6 = arith.constant 0 : index
    %c0_7 = arith.constant 0 : index
    %6 = vector.load %arg3[%c0_5, %c0_6, %c0_7] : memref<2x8x64xf32, #tpu.memory_space<vmem>>, vector<2x2x64xf32>
    tpu.vector_store %arg3[%c0_5, %c0_6, %c0_7], %5 {strides = array<i32>} : memref<2x8x64xf32, #tpu.memory_space<vmem>>, vector<2x2x64xf32>,
    %c0_8 = arith.constant 0 : index
    %c6 = arith.constant 6 : index
    %c0_9 = arith.constant 0 : index
    %7 = vector.load %arg3[%c0_8, %c6, %c0_9] : memref<2x8x64xf32, #tpu.memory_space<vmem>>, vector<2x2x64xf32>
    tpu.vector_store %arg3[%c0_8, %c6, %c0_9], %5 {strides = array<i32>} : memref<2x8x64xf32, #tpu.memory_space<vmem>>, vector<2x2x64xf32>,
    %c0_10 = arith.constant 0 : index
    %c2 = arith.constant 2 : index
    %c0_11 = arith.constant 0 : index
    %8 = vector.load %arg3[%c0_10, %c2, %c0_11] : memref<2x8x64xf32, #tpu.memory_space<vmem>>, vector<2x4x64xf32>
    tpu.vector_store %arg3[%c0_10, %c2, %c0_11], %4 {strides = array<i32>} : memref<2x8x64xf32, #tpu.memory_space<vmem>>, vector<2x4x64xf32>,
    return
  }
  func.func @transform_0(%arg0: i32) -> (i32, i32, i32) {
    %c0_i32 = arith.constant 0 : i32
    %c0_i32_0 = arith.constant 0 : i32
    %c0_i32_1 = arith.constant 0 : i32
    return %arg0, %c0_i32, %c0_i32_0 : i32, i32, i32
  }
  func.func @transform_1(%arg0: i32) -> (i32, i32) {
    %c0_i32 = arith.constant 0 : i32
    %c0_i32_0 = arith.constant 0 : i32
    %c0_i32_1 = arith.constant 0 : i32
    return %c0_i32, %c0_i32_0 : i32, i32
  }
  func.func @transform_2(%arg0: i32) -> (i32, i32, i32) {
    %c0_i32 = arith.constant 0 : i32
    %c0_i32_0 = arith.constant 0 : i32
    %c0_i32_1 = arith.constant 0 : i32
    return %arg0, %c0_i32, %c0_i32_0 : i32, i32, i32
  }
}

</mosaic_0001>

<bundles_post_ra>
// kernel: tpu_custom_call.1
= control target key start
LH: loop header
LB: loop body
LE: loop exit
PB: predicated region body
PF: predicated region fallthrough
CT: control target
= control target key end

     0   :  { %s380_s0 = inlined_call_operand.vmem [shape: f32[2,4,256], index: 0, kind: input, shape index: {}]   ;;  %s381_s1 = inlined_call_operand.vmem [shape: f32[256,64], index: 1, kind: input, shape index: {}]   ;;  %s382_s2 = inlined_call_operand.hbm [shape: f32[2,8,64], index: 2, kind: output, shape index: {}]  }
   0x1   :  { %v30_v0 = vld [vmem:[%s381_s1 + $0x80] sm:$0xff]  ;;  %v31_v1 = vld [vmem:[%s381_s1 + $0x88] sm:$0xff]  ;;  %v32_v5 = vld [vmem:[%s381_s1 + $0x90] sm:$0xff] }
   0x2   :  { %v14_v2 = vld [vmem:[%s381_s1] sm:$0xff]  ;;  %v184_v3 = vpack.c.bf16 %v31_v1, %v30_v0  ;;  %v15_v4 = vld [vmem:[%s381_s1 + $0x8] sm:$0xff]  ;;  %v33_v6 = vld [vmem:[%s381_s1 + $0x98] sm:$0xff] }
   0x3   :  { %v186_v7 = vpack.c.bf16 %v15_v4, %v14_v2  ;;  %v188_v8 = vpack.c.bf16 %v33_v6, %v32_v5  ;;  %v16_v9 = vld [vmem:[%s381_s1 + $0x10] sm:$0xff]  ;;  %v17_v10 = vld [vmem:[%s381_s1 + $0x18] sm:$0xff]  ;;  %v34_v11 = vld [vmem:[%s381_s1 + $0xa0] sm:$0xff] }
   0x4   :  { %185 = vmatprep.subr.bf16.mxu0 %v184_v3  ;;  %v35_v12 = vld [vmem:[%s381_s1 + $0xa8] sm:$0xff]  ;;  %v190_v13 = vpack.c.bf16 %v17_v10, %v16_v9  ;;  %v18_v15 = vld [vmem:[%s381_s1 + $0x20] sm:$0xff]  ;;  %v36_v17 = vld [vmem:[%s381_s1 + $0xb0] sm:$0xff] }
   0x5   :  { %187 = vmatpush3.bf16.msra.mxu0 %v186_v7  ;;  %v192_v14 = vpack.c.bf16 %v35_v12, %v34_v11  ;;  %v19_v16 = vld [vmem:[%s381_s1 + $0x28] sm:$0xff]  ;;  %v37_v18 = vld [vmem:[%s381_s1 + $0xb8] sm:$0xff]  ;;  %v20_v21 = vld [vmem:[%s381_s1 + $0x30] sm:$0xff] }
   0x6   :  { %189 = vmatprep.subr.bf16.mxu0 %v188_v8  ;;  %v194_v19 = vpack.c.bf16 %v19_v16, %v18_v15  ;;  %v196_v20 = vpack.c.bf16 %v37_v18, %v36_v17  ;;  %v21_v22 = vld [vmem:[%s381_s1 + $0x38] sm:$0xff]  ;;  %v38_v23 = vld [vmem:[%s381_s1 + $0xc0] sm:$0xff]  ;;  %v39_v24 = vld [vmem:[%s381_s1 + $0xc8] sm:$0xff] }
   0x7   :  { %v222_v25 = vld [vmem:[%s380_s0 + $0x4] ss:$8 sps:$4 sm:$0xff]   ;;  %v198_v26 = vpack.c.bf16 %v21_v22, %v20_v21 }
   0x9   :  { %191 = vmatpush3.bf16.msra.mxu0 %v190_v13 }
   0xa   :  { %193 = vmatprep.subr.bf16.mxu0 %v192_v14 }
   0xd   :  { %195 = vmatpush3.bf16.msra.mxu0 %v194_v19 }
   0xe   :  { %7 = vsyncpa [#allocation3], 0  ;;  %197 = vmatprep.subr.bf16.mxu0 %v196_v20  ;;  %v200_v27 = vpack.c.bf16 %v39_v24, %v38_v23  ;;  %v22_v28 = vld [vmem:[%s381_s1 + $0x40] sm:$0xff]  ;;  %v23_v29 = vld [vmem:[%s381_s1 + $0x48] sm:$0xff]  ;;  %116 = vmatprep.mubr.f32.mxu0 %v222_v25  ;;  %vm125_vm0 = vcmask 517120   ;;  %v247_v50 = vmov 0.0  }
   0xf   :  { %v40_v30 = vld [vmem:[%s381_s1 + $0xd0] sm:$0xff]  ;;  %v41_v31 = vld [vmem:[%s381_s1 + $0xd8] sm:$0xff]  ;;  %v202_v32 = vpack.c.bf16 %v23_v29, %v22_v28  ;;  %v42_v36 = vld [vmem:[%s381_s1 + $0xe0] sm:$0xff]  ;;  %126 = vst.msk [vmem:[#allocation2] sm:$0x3] %vm125_vm0, %v247_v50  ;;  %s248_s21 = smov [#allocation2]  }
  0x10   :  { %v204_v33 = vpack.c.bf16 %v41_v31, %v40_v30  ;;  %v24_v34 = vld [vmem:[%s381_s1 + $0x50] sm:$0xff]  ;;  %v25_v35 = vld [vmem:[%s381_s1 + $0x58] sm:$0xff]  ;;  %v43_v37 = vld [vmem:[%s381_s1 + $0xe8] sm:$0xff]  ;;  %127 = vst.msk [vmem:[#allocation2 + $0x8] sm:$0x3] %vm125_vm0, %v247_v50  ;;  %s138_s22 = sshll.u32 %s248_s21, 4  ;;  %s139_s22 = int_to_ptr.vmem [resolvable:$true] %s138_s22 }
  0x11   :  { %199 = vmatpush3.bf16.msra.mxu0 %v198_v26  ;;  %v206_v38 = vpack.c.bf16 %v25_v35, %v24_v34  ;;  %v208_v39 = vpack.c.bf16 %v43_v37, %v42_v36  ;;  %v26_v40 = vld [vmem:[%s381_s1 + $0x60] sm:$0xff]  ;;  %v27_v41 = vld [vmem:[%s381_s1 + $0x68] sm:$0xff]  ;;  %v44_v42 = vld [vmem:[%s381_s1 + $0xf0] sm:$0xff]  ;;  %128 = vst.msk [vmem:[#allocation2 + $0x6] sm:$0x3] %vm125_vm0, %v247_v50  ;;  %vm130_vm1 = vcmask 519168   ;;  %p228_p1 = scmp.lt.s32.totalorder %s139_s22, %s139_s22 }
  0x12   :  { %201 = vmatprep.subr.bf16.mxu0 %v200_v27  ;;  %v45_v43 = vld [vmem:[%s381_s1 + $0xf8] sm:$0xff]  ;;  %v210_v44 = vpack.c.bf16 %v27_v41, %v26_v40  ;;  %v28_v46 = vld [vmem:[%s381_s1 + $0x70] sm:$0xff]  ;;  %v220_v49 = vld [vmem:[%s380_s0] ss:$8 sps:$4 sm:$0xff]   ;;  %129 = vst.msk [vmem:[#allocation2 + $0xe] sm:$0x3] %vm125_vm0, %v247_v50 }
  0x13   :  { %v212_v45 = vpack.c.bf16 %v45_v43, %v44_v42  ;;  %v29_v47 = vld [vmem:[%s381_s1 + $0x78] sm:$0xff]  ;;  %s223_s1 = scalar_lea.vmem %s139_s22, 256 }
  0x14   :  { %v214_v48 = vpack.c.bf16 %v29_v47, %v28_v46  ;;  %p224_p0 = scmp.ne.s32.totalorder %s139_s22, %s223_s1  ;;  %p229_p2 = scmp.lt.s32.totalorder %s223_s1, %s223_s1 }
  0x15   :  { %203 = vmatpush3.bf16.msra.mxu0 %v202_v32 }
  0x16   :  { %205 = vmatprep.subr.bf16.mxu0 %v204_v33  ;;  %p230_p3 = por %p229_p2, %p228_p1 }
  0x18   :  { %p231_p4 = pnand %p230_p3, %p224_p0 }
  0x19   :  { %207 = vmatpush3.bf16.msra.mxu0 %v206_v38 }
  0x1a   :  { %209 = vmatprep.subr.bf16.mxu0 %v208_v39 }
  0x1d   :  { %211 = vmatpush3.bf16.msra.mxu0 %v210_v44 }
  0x1e   :  { %213 = vmatprep.subr.bf16.mxu0 %v212_v45 }
  0x21   :  { %215 = vmatpush3.bf16.msra.mxu0 %v214_v48 }
  0x24   :  { %117 = vmatmul.mubr.f32.vlgmr.msra.gmra.mrb[0].mxu0 %v220_v49 }
  0xf7   :  { %v181_v51 = vpop.f32.mrb[0].mxu0 }
  0xf8   :  { %v182_v52 = vpop.f32.mrb[1].mxu0 }
  0xf9   :  { %v183_v53 = vadd.f32 %v182_v52, %v181_v51 }
  0xfb   :  { %v123_v54 = vcombine.high %v183_v53, %v183_v53  ;;  %131 = vst.msk [vmem:[#allocation2 + $0x2] sm:$0xf] %vm130_vm1, %v183_v53 }
  0xfd   :  { %132 = vst.msk [vmem:[#allocation2 + $0xa] sm:$0xf] %vm130_vm1, %v123_v54 }
  0xfe   :  { %234 = shalt.err (!%p231_p4)
}
  0xff   :  { %s235_s24 = scalar_lea.hbm %s382_s2, 256 }
 0x100   :  { %p236_p5 = scmp.ne.s32.totalorder %s382_s2, %s235_s24  ;;  %p239_p6 = scmp.lt.u32.totalorder %s235_s24, %s382_s2 }
 0x102   :  { %p241_p7 = pnand %p239_p6, %p236_p5 }
 0x104   :  { %244 = shalt.err (!%p241_p7)
}
 0x105   :  { %s249_s29 = smov 128   ;;  %s250_s30 = smov 8  }
 0x106   :  { %144 = dma.vmem_to_hbm [thread:$0]  %s139_s22, 256, %s382_s2, [#allocation3], %s249_s29, %s249_s29, %s250_s30  }
 0x107   :  { %245 = dma.done.wait [#allocation3], 256  }
 0x108   :  { %246 = vsyncadd [#allocation3], 4294967040 }
 0x109   :  { %148 = vsyncpa [#allocation3], 1 }

</bundles_post_ra>
